<compile_context>
chip_gen: v7x
topology: tpu7x:2x2x1
jax: 0.10.0
libtpu: 0.0.40
codegen_flags: <defaults>
</compile_context>

<pallas_src>
import functools

import jax
import jax.numpy as jnp
from jax.experimental import pallas as pl
from jax.experimental.pallas import tpu as pltpu


def _head_kernel(BC, HW, x_ref, w1_ref, b1_ref, w2_ref, b2_ref, o_ref):
    """One batch-chunk per grid step.

    x_ref : (BC*HW, Kp)   bf16 im2col slab (Kp = 9*Cin zero-padded to 128x)
    w1_ref: (Kp, Cmid)    bf16 fused 3x3 conv weights
    b1_ref: (1, Cmid)     f32
    w2_ref: (Cmid, Lp)    f32 1x1 conv weights (labels zero-padded to Lp)
    b2_ref: (1, Lp)       f32
    o_ref : (1, BC, Lp)   f32 sigmoid(pooled logits) for this chunk
    """
    # Fused 3x3 conv: single MXU matmul, f32 accumulation.
    y = jnp.dot(x_ref[...], w1_ref[...], preferred_element_type=jnp.float32)
    y = jnp.maximum(y + b1_ref[...], 0.0)                  # bias + ReLU (f32 VPU)

    cmid = y.shape[-1]
    # AdaptiveAvgPool2d(1) commutes with the linear 1x1 conv -> pool first.
    pooled = jnp.mean(y.reshape(BC, HW, cmid), axis=1)     # (BC, Cmid)

    logits = jnp.dot(pooled, w2_ref[...],
                     preferred_element_type=jnp.float32) + b2_ref[...]  # (BC, Lp)

    o_ref[...] = jax.nn.sigmoid(logits).reshape(o_ref.shape)


def multilabel_classification_forward(inputs, params, level=5, num_chunks=2):
    """inputs: list of NCHW feature maps; returns (scores, labels) like the torch module."""
    x = inputs[level]                        # (B, Cin, H, W), NCHW from a PyTorch backbone
    B, Cin, H, W = x.shape
    HW = H * W

    if num_chunks < 1 or B % num_chunks != 0:
        num_chunks = 1
    NC = num_chunks
    BC = B // NC

    w1, b1, w2, b2 = params["w1"], params["b1"], params["w2"], params["b2"]
    Cmid = w1.shape[-1]
    L = w2.shape[-1]
    K = 9 * Cin
    Kp = ((K + 127) // 128) * 128            # lane/MXU-aligned contracting dim
    Lp = ((L + 127) // 128) * 128            # lane-dense output width

    # NCHW -> NHWC; bf16 MXU operands (accumulation stays f32 in-kernel).
    x_nhwc = jnp.transpose(x, (0, 2, 3, 1)).astype(jnp.bfloat16)
    x_pad = jnp.pad(x_nhwc, ((0, 0), (1, 1), (1, 1), (0, 0)))  # zero pad for 3x3 "same"
    # TODO(synk): for large low-level feature maps, fold the halo/im2col into the
    # kernel (masked border taps) instead of this wrapper-side pad + concat.

    # im2col: 9 shifted views, tap-major (row-major over kh, kw) to match w1 layout.
    taps = [x_pad[:, dh:dh + H, dw:dw + W, :] for dh in range(3) for dw in range(3)]
    xcol = jnp.concatenate(taps, axis=-1).reshape(B * HW, K)
    xcol = jnp.pad(xcol, ((0, 0), (0, Kp - K)))              # lane-dense, zero-padded K

    w1p = jnp.pad(w1.reshape(K, Cmid).astype(jnp.bfloat16), ((0, Kp - K), (0, 0)))
    b1f = b1.astype(jnp.float32)
    w2p = jnp.pad(w2.astype(jnp.float32), ((0, 0), (0, Lp - L)))
    b2p = jnp.pad(b2.astype(jnp.float32), ((0, 0), (0, Lp - L)))

    kernel = functools.partial(_head_kernel, BC, HW)
    out = pl.pallas_call(
        kernel,
        out_shape=jax.ShapeDtypeStruct((NC, BC, Lp), jnp.float32),
        grid=(NC,),
        in_specs=[
            pl.BlockSpec((BC * HW, Kp), lambda c: (c, 0)),   # im2col chunk
            pl.BlockSpec((Kp, Cmid), lambda c: (0, 0)),      # fused conv weights
            pl.BlockSpec((1, Cmid), lambda c: (0, 0)),
            pl.BlockSpec((Cmid, Lp), lambda c: (0, 0)),
            pl.BlockSpec((1, Lp), lambda c: (0, 0)),
        ],
        out_specs=pl.BlockSpec((1, BC, Lp), lambda c: (c, 0, 0)),
        compiler_params=pltpu.CompilerParams(dimension_semantics=("parallel",)),
    )(xcol, w1p, b1f, w2p, b2p)

    probs = out.reshape(B, Lp)[:, :L]
    # TODO(synk): torch.sort(descending=True) has no clean in-kernel Pallas
    # equivalent; done with XLA argsort in the wrapper (ties may break
    # differently than torch.sort, scores identical).
    labels = jnp.argsort(-probs, axis=-1)
    scores = jnp.take_along_axis(probs, labels, axis=-1)
    return scores, labels


def init_params(key, in_channels, num_labels, num_channels=32):
    """Deterministic synthetic parameters (shapes match the torch module with num_layers=1)."""
    k1, k2, k3, k4 = jax.random.split(key, 4)
    # Torch Conv2d weight is (out, in, kh, kw); we store the 3x3 conv tap-major
    # as (kh*kw, in, out) so it flattens directly to the (9*Cin, Cmid) matmul operand.
    w1 = jax.random.normal(k1, (9, in_channels, num_channels), jnp.float32) * 0.1
    b1 = jax.random.normal(k2, (1, num_channels), jnp.float32) * 0.1
    w2 = jax.random.normal(k3, (num_channels, num_labels), jnp.float32) * 0.1
    b2 = jax.random.normal(k4, (1, num_labels), jnp.float32) * 0.1
    return {"w1": w1, "b1": b1, "w2": w2, "b2": b2}


def _reference_forward(inputs, params, level=5):
    """Pure-JAX reference (lax conv) on the same bf16-rounded operands the kernel sees."""
    x = jnp.transpose(inputs[level], (0, 2, 3, 1))
    x = x.astype(jnp.bfloat16).astype(jnp.float32)                       # NHWC
    w1 = params["w1"].astype(jnp.bfloat16).astype(jnp.float32)
    w1 = w1.reshape(3, 3, x.shape[-1], -1)                               # HWIO
    y = jax.lax.conv_general_dilated(
        x, w1, (1, 1), "SAME",
        dimension_numbers=("NHWC", "HWIO", "NHWC"),
        precision=jax.lax.Precision.HIGHEST)
    y = jnp.maximum(y + params["b1"][0], 0.0)
    pooled_y = jnp.mean(y, axis=(1, 2))                                  # pool-then-1x1 (commutes)
    logits = jnp.dot(pooled_y, params["w2"].astype(jnp.float32),
                     precision=jax.lax.Precision.HIGHEST) + params["b2"][0]
    probs = jax.nn.sigmoid(logits)
    labels = jnp.argsort(-probs, axis=-1)
    scores = jnp.take_along_axis(probs, labels, axis=-1)
    return scores, labels


if __name__ == "__main__":
    # Small shapes: level=5 head attached to a 6-level feature pyramid.
    B, Cin, H, W = 2, 4, 16, 16
    num_labels, num_channels, level = 8, 32, 5
    in_channels = [Cin] * 6

    key = jax.random.PRNGKey(0)
    k_feat, k_param = jax.random.split(key)
    # Only inputs[level] is consumed; other levels are small dummies.
    feats = [jax.random.normal(jax.random.fold_in(k_feat, i), (B, Cin, 4, 4), jnp.float32)
             for i in range(5)]
    feats.append(jax.random.normal(jax.random.fold_in(k_feat, 5), (B, Cin, H, W), jnp.float32))

    params = init_params(k_param, in_channels[level], num_labels, num_channels)

    scores, labels = multilabel_classification_forward(feats, params, level=level)
    scores = jax.block_until_ready(scores)
    labels = jax.block_until_ready(labels)

    ref_scores, ref_labels = _reference_forward(feats, params, level=level)
    assert scores.shape == (B, num_labels) and labels.shape == (B, num_labels)
    assert jnp.allclose(scores, ref_scores, atol=1e-4, rtol=1e-4)
    assert jnp.array_equal(labels, ref_labels)

    print("KERNEL_OK")
</pallas_src>

<mosaic_0001>
module attributes {stable_mosaic.version = 11 : i64} {
  func.func @_head_kernel(%arg0: i32, %arg1: memref<256x128xbf16, #tpu.memory_space<vmem>>, %arg2: memref<128x32xbf16, #tpu.memory_space<vmem>>, %arg3: memref<1x32xf32, #tpu.memory_space<vmem>>, %arg4: memref<32x128xf32, #tpu.memory_space<vmem>>, %arg5: memref<1x128xf32, #tpu.memory_space<vmem>>, %arg6: memref<1x1x128xf32, #tpu.memory_space<vmem>>) attributes {dimension_semantics = [#tpu.dimension_semantics<parallel>], iteration_bounds = array<i64: 2>, scalar_prefetch = 0 : i64, scratch_operands = 0 : i64, tpu.core_type = #tpu.core_type<tc>, window_params = [{transform_indices = @transform_0, window_bounds = array<i64: 256, 128>}, {pipeline_mode = #tpu.pipeline_mode<synchronous>, transform_indices = @transform_1, window_bounds = array<i64: 128, 32>}, {pipeline_mode = #tpu.pipeline_mode<synchronous>, transform_indices = @transform_2, window_bounds = array<i64: 1, 32>}, {pipeline_mode = #tpu.pipeline_mode<synchronous>, transform_indices = @transform_3, window_bounds = array<i64: 32, 128>}, {pipeline_mode = #tpu.pipeline_mode<synchronous>, transform_indices = @transform_4, window_bounds = array<i64: 1, 128>}, {transform_indices = @transform_5, window_bounds = array<i64: 1, 1, 128>}]} {
    %c0 = arith.constant 0 : index
    %c0_0 = arith.constant 0 : index
    %0 = vector.load %arg1[%c0, %c0_0] : memref<256x128xbf16, #tpu.memory_space<vmem>>, vector<256x128xbf16>
    %c0_1 = arith.constant 0 : index
    %c0_2 = arith.constant 0 : index
    %1 = vector.load %arg2[%c0_1, %c0_2] : memref<128x32xbf16, #tpu.memory_space<vmem>>, vector<128x32xbf16>
    %cst = arith.constant dense<0.000000e+00> : vector<256x32xf32>
    %2 = tpu.matmul %0, %1, %cst {dimension_numbers = #tpu.dot_dimension_numbers<[1], [0], [0], [1], [0, 0, 1, 1], [], []>} : vector<256x128xbf16>, vector<128x32xbf16>, vector<256x32xf32> -> vector<256x32xf32>
    %c0_3 = arith.constant 0 : index
    %c0_4 = arith.constant 0 : index
    %3 = vector.load %arg3[%c0_3, %c0_4] : memref<1x32xf32, #tpu.memory_space<vmem>>, vector<1x32xf32>
    %4 = vector.broadcast %3 : vector<1x32xf32> to vector<256x32xf32>
    %5 = arith.addf %2, %4 : vector<256x32xf32>
    %cst_5 = arith.constant 0.000000e+00 : f32
    %6 = vector.broadcast %cst_5 : f32 to vector<256x32xf32>
    %7 = arith.maximumf %5, %6 : vector<256x32xf32>
    %8 = vector.shape_cast %7 : vector<256x32xf32> to vector<1x256x32xf32>
    %cst_6 = arith.constant dense<0.000000e+00> : vector<1x32xf32>
    %9 = vector.multi_reduction <add>, %8, %cst_6 [1] : vector<1x256x32xf32> to vector<1x32xf32>
    %cst_7 = arith.constant 2.560000e+02 : f32
    %10 = vector.broadcast %cst_7 : f32 to vector<1x32xf32>
    %11 = arith.divf %9, %10 : vector<1x32xf32>
    %c0_8 = arith.constant 0 : index
    %c0_9 = arith.constant 0 : index
    %12 = vector.load %arg4[%c0_8, %c0_9] : memref<32x128xf32, #tpu.memory_space<vmem>>, vector<32x128xf32>
    %cst_10 = arith.constant dense<0.000000e+00> : vector<1x128xf32>
    %13 = tpu.matmul %11, %12, %cst_10 {dimension_numbers = #tpu.dot_dimension_numbers<[1], [0], [0], [1], [0, 0, 1, 1], [], []>} : vector<1x32xf32>, vector<32x128xf32>, vector<1x128xf32> -> vector<1x128xf32>
    %c0_11 = arith.constant 0 : index
    %c0_12 = arith.constant 0 : index
    %14 = vector.load %arg5[%c0_11, %c0_12] : memref<1x128xf32, #tpu.memory_space<vmem>>, vector<1x128xf32>
    %15 = arith.addf %13, %14 : vector<1x128xf32>
    %16 = arith.negf %15 : vector<1x128xf32>
    %17 = math.exp %16 : vector<1x128xf32>
    %cst_13 = arith.constant 1.000000e+00 : f32
    %18 = vector.broadcast %cst_13 : f32 to vector<1x128xf32>
    %19 = arith.addf %18, %17 : vector<1x128xf32>
    %20 = arith.divf %18, %19 : vector<1x128xf32>
    %21 = vector.shape_cast %20 : vector<1x128xf32> to vector<1x1x128xf32>
    %c0_14 = arith.constant 0 : index
    %c0_15 = arith.constant 0 : index
    %c0_16 = arith.constant 0 : index
    %22 = vector.load %arg6[%c0_14, %c0_15, %c0_16] : memref<1x1x128xf32, #tpu.memory_space<vmem>>, vector<1x1x128xf32>
    tpu.vector_store %arg6[%c0_14, %c0_15, %c0_16], %21 {strides = array<i32>} : memref<1x1x128xf32, #tpu.memory_space<vmem>>, vector<1x1x128xf32>,
    return
  }
  func.func @transform_0(%arg0: i32) -> (i32, i32) {
    %c0_i32 = arith.constant 0 : i32
    %c0_i32_0 = arith.constant 0 : i32
    return %arg0, %c0_i32 : i32, i32
  }
  func.func @transform_1(%arg0: i32) -> (i32, i32) {
    %c0_i32 = arith.constant 0 : i32
    %c0_i32_0 = arith.constant 0 : i32
    %c0_i32_1 = arith.constant 0 : i32
    return %c0_i32, %c0_i32_0 : i32, i32
  }
  func.func @transform_2(%arg0: i32) -> (i32, i32) {
    %c0_i32 = arith.constant 0 : i32
    %c0_i32_0 = arith.constant 0 : i32
    %c0_i32_1 = arith.constant 0 : i32
    return %c0_i32, %c0_i32_0 : i32, i32
  }
  func.func @transform_3(%arg0: i32) -> (i32, i32) {
    %c0_i32 = arith.constant 0 : i32
    %c0_i32_0 = arith.constant 0 : i32
    %c0_i32_1 = arith.constant 0 : i32
    return %c0_i32, %c0_i32_0 : i32, i32
  }
  func.func @transform_4(%arg0: i32) -> (i32, i32) {
    %c0_i32 = arith.constant 0 : i32
    %c0_i32_0 = arith.constant 0 : i32
    %c0_i32_1 = arith.constant 0 : i32
    return %c0_i32, %c0_i32_0 : i32, i32
  }
  func.func @transform_5(%arg0: i32) -> (i32, i32, i32) {
    %c0_i32 = arith.constant 0 : i32
    %c0_i32_0 = arith.constant 0 : i32
    %c0_i32_1 = arith.constant 0 : i32
    return %arg0, %c0_i32, %c0_i32_0 : i32, i32, i32
  }
}

</mosaic_0001>

<bundles_post_ra>
// kernel: tpu_custom_call.1
= control target key start
LH: loop header
LB: loop body
LE: loop exit
PB: predicated region body
PF: predicated region fallthrough
CT: control target
= control target key end

     0   :  { %10 = vsyncpa [#allocation3], 0  ;;  %s1559_s0 = inlined_call_operand.hbm [shape: bf16[512,128], index: 0, kind: input, shape index: {}]   ;;  %s1560_s1 = inlined_call_operand.vmem [shape: bf16[128,32], index: 1, kind: input, shape index: {}]   ;;  %s1561_s2 = inlined_call_operand.vmem [shape: f32[1,32], index: 2, kind: input, shape index: {}]   ;;  %s1562_s3 = inlined_call_operand.vmem [shape: f32[32,128], index: 3, kind: input, shape index: {}]   ;;  %s1563_s4 = inlined_call_operand.vmem [shape: f32[1,128], index: 4, kind: input, shape index: {}]   ;;  %s1564_s5 = inlined_call_operand.hbm [shape: f32[2,1,128], index: 5, kind: output, shape index: {}]  }
   0x1   :  { %12 = vsyncpa [#allocation3 + $0x1], 0 }
   0x2   :  { %13 = vsyncpa [#allocation4], 0 }
   0x3   :  { %15 = vsyncpa [#allocation4 + $0x1], 0  ;;  %s1235_s18 = smov 0   ;;  %s1237_s19 = smov 0  }
   0x4   :  { %s1239_s20 = smov 0   ;;  %s1241_s21 = smov 0  }
   0x5 LB: > { %s1256_s22 = sadd.s32 4294967295, %s1196_s21   ;;  %s872_s23 = sadd.s32 4294967294, %s1196_s21   ;;  %s1196_s21 = sphi %s1241_s21, %s1577_s21   ;;  %s1192_s20 = sphi %s1239_s20, %s1576_s20   ;;  %s1188_s19 = sphi %s1237_s19, %s1575_s19   ;;  %s1184_s18 = sphi %s1235_s18, %s1574_s18  }
   0x6   : > { %s1260_s24 = sadd.s32 1, %s1196_s21   ;;  %s28_s25 = sadd.s32 1, %s1192_s20 }
   0x7   : > { %s25_s26 = ssub.s32 %s1196_s21, %s1260_s24  ;;  %p35_p0 = scmp.ne.s32.totalorder %s1192_s20, %s1188_s19 }
   0x8   : > { %p26_p1 = scmp.eq.s32.totalorder %s25_s26, 0  ;;  %p36_p2 = scmp.eq.s32.totalorder %s1196_s21, 0 }
   0x9   : > { %p41_p3 = scmp.ne.s32.totalorder %s1188_s19, %s1184_s18  ;;  %p42_p4 = scmp.eq.s32.totalorder %s1256_s22, 0 }
   0xa   : > { %s1272_s27 = scalar_select %p26_p1, %s1192_s20, %s28_s25  }
   0xb   : > { %p1274_p5 = por %p36_p2, %p35_p0  ;;  %p1278_p6 = por %p42_p4, %p41_p3 }
   0xc   : > { %p149_p7 = scmp.eq.s32.totalorder %s1256_s22, 1  ;;  %p155_p8 = scmp.eq.s32.totalorder %s872_s23, 1 }
   0xd   : > { %p1033_p10 = scmp.lt.s32.totalorder %s1196_s21, 2  ;;  %s187_s7 = sand.u32 1, %s1192_s20  }
   0xe   : > { %p1285_p11 = por %p149_p7, %p35_p0  ;;  %p1289_p12 = por %p155_p8, %p41_p3 }
   0xf   : > { %s910_s8 = sshll.u32 %s1196_s21, 11  ;;  %s875_s9 = sshll.u32 %s187_s7, 7 }
  0x10   : > { %s1568_s30 = scalar_select %p1285_p11, 1, 0 }
  0x11   : > { %s1569_s6 = scalar_select %p1289_p12, 1, 0 }
  0x12   : > { %s1298_s12 = scalar_lea.hbm %s1559_s0, %s910_s8  ;;  %s191_s13 = scalar_lea.vmem [#allocation2], %s875_s9 }
  0x13   : > { %s198_s14 = sshll.u32 %s191_s13, 4  ;;  %p1302_p13 = pnand %p1033_p10, %p1274_p5  ;;  %s1306_s14 = int_to_ptr.vmem [resolvable:$true] %s198_s14 }
  0x14   : > { %s1308_s16 = scalar_lea.sflag [#allocation3], %s187_s7  ;;  %s1100_s17 = scalar_lea.hbm %s1298_s12, 2048 }
  0x15   : > { %p1101_p0 = scmp.ne.s32.totalorder %s1298_s12, %s1100_s17  ;;  %p1102_p1 = pneg %p1302_p13 }
  0x16   : > { %s1105_s26 = scalar_lea.hbm %s1559_s0, 4096  ;;  %p1106_p4 = scmp.lt.u32.totalorder %s1298_s12, %s1559_s0 }
  0x17   : > { %p1103_p2 = pnand %p1102_p1, %p1101_p0  ;;  %p1107_p5 = scmp.lt.u32.totalorder %s1105_s26, %s1100_s17 }
  0x18   : > { %p1109_p8 = scmp.lt.u32.totalorder %s1100_s17, %s1298_s12 }
  0x19   : > { %p1104_p3 = pneg %p1103_p2  ;;  %p1108_p7 = por %p1107_p5, %p1106_p4 }
  0x1b   : > { %p1110_p10 = por %p1109_p8, %p1108_p7 }
  0x1d   : > { %p1111_p9 = pnand %p1110_p10, %p1104_p3 }
  0x1f   : > { %1114 = shalt.err (!%p1111_p9)
}
  0x20   : > { %s1115_s7 = scalar_lea.vmem %s1306_s14, 2048  ;;  %s1198_s9 = smov [#allocation2]  }
  0x21   : > { %p1116_p0 = scmp.ne.s32.totalorder %s1306_s14, %s1115_s7  ;;  %s1120_s10 = sshll.u32 %s1198_s9, 4  ;;  %s1121_s10 = int_to_ptr.vmem [resolvable:$false] %s1120_s10 }
  0x22   : > { %s1122_s11 = scalar_lea.vmem %s1121_s10, 4096  ;;  %p1123_p11 = scmp.lt.s32.totalorder %s1306_s14, %s1121_s10 }
  0x23   : > { %p1118_p2 = pnand %p1116_p0, %p1102_p1  ;;  %p1124_p4 = scmp.lt.s32.totalorder %s1122_s11, %s1115_s7 }
  0x25   : > { %p1119_p12 = pneg %p1118_p2  ;;  %p1125_p5 = por %p1124_p4, %p1123_p11 }
  0x27   : > { %p1126_p7 = pnand %p1125_p5, %p1119_p12 }
  0x29   : > { %1129 = shalt.err (!%p1126_p7)
}
  0x2a   : > { %s1199_s13 = smov 64   ;;  %s1200_s17 = smov 4  }
  0x2b   : > { %1028 = dma.hbm_to_vmem [thread:$0]  (!%p1302_p13), %s1298_s12, 2048, %s1306_s14, %s1308_s16, %s1199_s13, %s1199_s13, %s1200_s17  }
  0x2c   : > { %p878_p9 = scmp.ge.s32.totalorder %s1196_s21, 1  ;;  %p206_p1 = scmp.lt.s32.totalorder %s1196_s21, 3 }
  0x2e   : > { %p207_p3 = pnand %p878_p9, %p206_p1 }
  0x2f   : > { %s1339_s23 = sand.u32 (!%p207_p3), 1, %s1188_s19  }
  0x30   : > { %210 = sbr.rel (%p207_p3) target bundleno = 639 (0x27f), region = 40  ;;  %s879_s25 = sshll.u32 (!%p207_p3), %s1339_s23, 7 }
  0x31   : > { %s213_s26 = scalar_lea.sflag (!%p207_p3), [#allocation3], %s1339_s23  ;;  %s1343_s28 = scalar_lea.vmem (!%p207_p3), [#allocation2], %s879_s25 }
  0x37   : > { %1175 = dma.done.wait (%p1278_p6), %s213_s26, 2048  }
  0x38   : > { %1177 = vsyncadd (%p1278_p6), %s213_s26, 4294965248  ;;  %v1072_v0 = vld [vmem:[%s1560_s1] sm:$0xff]   ;;  %v1073_v1 = vld [vmem:[%s1560_s1 + $0x8] sm:$0xff]   ;;  %v1201_v27 = vmov 0.0|0.0   ;;  %vm1202_vm0 = vmmov 0   ;;  %v1203_v31 = vmov 0.0  }
  0x39   : > { %940 = vmatprep.subr.bf16.mxu0 %v1072_v0  ;;  %1005 = vmatprep.subr.bf16.mxu1 %v1072_v0  ;;  %v1074_v2 = vld [vmem:[%s1560_s1 + $0x10] sm:$0xff]   ;;  %v1075_v3 = vld [vmem:[%s1560_s1 + $0x18] sm:$0xff]   ;;  %v1080_v4 = vld [vmem:[%s1343_s28] sm:$0xff]   ;;  %vm636_vm1 = vcmask 261120   ;;  %s907_s26 = sshll.u32 %s1256_s22, 4  ;;  %s241_s12 = scalar_lea.vmem [#allocation5], %s1339_s23 }
  0x3a   : > { %941 = vmatpush3.bf16.msra.mxu0 %v1072_v0  ;;  %1013 = vmatpush3.bf16.msra.mxu1 %v1072_v0  ;;  %v1076_v5 = vld [vmem:[%s1560_s1 + $0x20] sm:$0xff]   ;;  %v1077_v6 = vld [vmem:[%s1560_s1 + $0x28] sm:$0xff]   ;;  %v1090_v7 = vld [vmem:[%s1343_s28 + $0x50] sm:$0xff]   ;;  %s806_s14 = sshll.u32 %s241_s12, 4  ;;  %s1515_s8 = scalar_lea.hbm %s1564_s5, %s907_s26  ;;  %s1517_s14 = int_to_ptr.vmem [resolvable:$true] %s806_s14 }
  0x3b   : > { %942 = vmatprep.subr.bf16.mxu0 %v1073_v1  ;;  %1006 = vmatprep.subr.bf16.mxu1 %v1073_v1  ;;  %v1078_v8 = vld [vmem:[%s1560_s1 + $0x30] sm:$0xff]   ;;  %v1079_v9 = vld [vmem:[%s1560_s1 + $0x38] sm:$0xff]   ;;  %v1081_v10 = vld [vmem:[%s1343_s28 + $0x8] sm:$0xff]   ;;  %s794_s7 = scalar_lea.sflag [#allocation4], %s1339_s23  ;;  %s1130_s29 = scalar_lea.vmem %s1517_s14, 16 }
  0x3c   : > { %956 = vmatprep.mubr.bf16.mxu0 %v1080_v4  ;;  %976 = vmatprep.mubr.bf16.mxu1 %v1090_v7  ;;  %v1091_v11 = vld [vmem:[%s1343_s28 + $0x58] sm:$0xff]   ;;  %v1082_v12 = vld [vmem:[%s1343_s28 + $0x10] sm:$0xff]   ;;  %v1092_v13 = vld [vmem:[%s1343_s28 + $0x60] sm:$0xff]   ;;  %p1131_p6 = scmp.ne.s32.totalorder %s1517_s14, %s1130_s29  ;;  %p1571_p11 = scmp.ne.s32.totalorder %s1568_s30, 0 }
  0x3d   : > { %v1083_v14 = vld [vmem:[%s1343_s28 + $0x18] sm:$0xff]   ;;  %v1093_v15 = vld [vmem:[%s1343_s28 + $0x68] sm:$0xff]   ;;  %v1084_v16 = vld [vmem:[%s1343_s28 + $0x20] sm:$0xff]   ;;  %s1204_s22 = smov [#allocation5]  }
  0x3e   : > { %943 = vmatpush3.bf16.msra.mxu0 %v1073_v1  ;;  %1014 = vmatpush3.bf16.msra.mxu1 %v1073_v1  ;;  %v1094_v17 = vld [vmem:[%s1343_s28 + $0x70] sm:$0xff]   ;;  %v1085_v18 = vld [vmem:[%s1343_s28 + $0x28] sm:$0xff]   ;;  %v1095_v19 = vld [vmem:[%s1343_s28 + $0x78] sm:$0xff]   ;;  %p1132_p12 = pnand %p1131_p6, %p1571_p11  ;;  %s1134_s9 = sshll.u32 %s1204_s22, 4  ;;  %s1135_s9 = int_to_ptr.vmem [resolvable:$false] %s1134_s9 }
  0x3f   : > { %944 = vmatprep.subr.bf16.mxu0 %v1074_v2  ;;  %1007 = vmatprep.subr.bf16.mxu1 %v1074_v2  ;;  %v1086_v20 = vld [vmem:[%s1343_s28 + $0x30] sm:$0xff]   ;;  %v1087_v21 = vld [vmem:[%s1343_s28 + $0x38] sm:$0xff]   ;;  %v1088_v22 = vld [vmem:[%s1343_s28 + $0x40] sm:$0xff]   ;;  %s1136_s10 = scalar_lea.vmem %s1135_s9, 32  ;;  %p1137_p8 = scmp.lt.s32.totalorder %s1517_s14, %s1135_s9 }
  0x40   : > { %v1089_v23 = vld [vmem:[%s1343_s28 + $0x48] sm:$0xff]   ;;  %v708_v24 = vld [vmem:[%s1562_s3] sm:$0xff]  ;;  %v710_v28 = vld [vmem:[%s1562_s3 + $0x10] sm:$0xff]  ;;  %p1133_p13 = pneg %p1132_p12  ;;  %p1138_p10 = scmp.lt.s32.totalorder %s1136_s10, %s1130_s29 }
  0x41   : > { %v709_v25 = vld [vmem:[%s1562_s3 + $0x8] sm:$0xff]  ;;  %v711_v29 = vld [vmem:[%s1562_s3 + $0x18] sm:$0xff]  ;;  %v1404_v32 = vld [vmem:[%s1561_s2] ss:$0 sm:$0xff] }
  0x42   : > { %945 = vmatpush3.bf16.msra.mxu0 %v1074_v2  ;;  %1015 = vmatpush3.bf16.msra.mxu1 %v1074_v2  ;;  %v1000_v26 = vpack.c.bf16 %v709_v25, %v708_v24  ;;  %v1003_v30 = vpack.c.bf16 %v711_v29, %v710_v28  ;;  %p1139_p0 = por %p1138_p10, %p1137_p8 }
  0x43   : > { %946 = vmatprep.subr.bf16.mxu0 %v1075_v3  ;;  %1008 = vmatprep.subr.bf16.mxu1 %v1075_v3 }
  0x44   : > { %p1140_p2 = pnand %p1139_p0, %p1133_p13 }
  0x46   : > { %947 = vmatpush3.bf16.msra.mxu0 %v1075_v3  ;;  %1016 = vmatpush3.bf16.msra.mxu1 %v1075_v3 }
  0x47   : > { %948 = vmatprep.subr.bf16.mxu0 %v1076_v5  ;;  %1009 = vmatprep.subr.bf16.mxu1 %v1076_v5 }
  0x4a   : > { %949 = vmatpush3.bf16.msra.mxu0 %v1076_v5  ;;  %1017 = vmatpush3.bf16.msra.mxu1 %v1076_v5 }
  0x4b   : > { %950 = vmatprep.subr.bf16.mxu0 %v1077_v6  ;;  %1010 = vmatprep.subr.bf16.mxu1 %v1077_v6 }
  0x4e   : > { %951 = vmatpush3.bf16.msra.mxu0 %v1077_v6  ;;  %1018 = vmatpush3.bf16.msra.mxu1 %v1077_v6 }
  0x4f   : > { %952 = vmatprep.subr.bf16.mxu0 %v1078_v8  ;;  %1011 = vmatprep.subr.bf16.mxu1 %v1078_v8 }
  0x52   : > { %953 = vmatpush3.bf16.msra.mxu0 %v1078_v8  ;;  %1019 = vmatpush3.bf16.msra.mxu1 %v1078_v8 }
  0x53   : > { %954 = vmatprep.subr.bf16.mxu0 %v1079_v9  ;;  %1012 = vmatprep.subr.bf16.mxu1 %v1079_v9 }
  0x56   : > { %955 = vmatpush3.bf16.msra.mxu0 %v1079_v9  ;;  %1020 = vmatpush3.bf16.msra.mxu1 %v1079_v9 }
  0x57   : > { %999 = vmatprep.subr.bf16.mxu1 %v1201_v27 }
  0x59   : > { %957 = vmatmul.mubr.bf16.vlgmr.msra.gmra.mrb[0].mxu0 %v1081_v10  ;;  %977 = vmatmul.mubr.bf16.vlgmr.msra.gmra.mrb[0].mxu1 %v1091_v11 }
  0x5a   : > { %960 = vmatprep.mubr.bf16.mxu0 %v1082_v12  ;;  %980 = vmatprep.mubr.bf16.mxu1 %v1092_v13 }
  0x5b   : > { %1001 = vmatpush3.bf16.msra.mxu1 %v1000_v26 }
  0x5c   : > { %1002 = vmatprep.subr.bf16.mxu1 %v1201_v27 }
  0x5f   : > { %1004 = vmatpush3.bf16.msra.mxu1 %v1003_v30 }
  0x61   : > { %961 = vmatmul.mubr.bf16.gmra.mrb[4].mxu0 %v1083_v14  ;;  %981 = vmatmul.mubr.bf16.gmra.mrb[4].mxu1 %v1093_v15 }
  0x62   : > { %964 = vmatprep.mubr.bf16.mxu0 %v1084_v16  ;;  %984 = vmatprep.mubr.bf16.mxu1 %v1094_v17 }
  0x69   : > { %965 = vmatmul.mubr.bf16.gmra.mrb[8].mxu0 %v1085_v18  ;;  %985 = vmatmul.mubr.bf16.gmra.mrb[8].mxu1 %v1095_v19 }
  0x6a   : > { %968 = vmatprep.mubr.bf16.mxu0 %v1086_v20  ;;  %996 = vmatprep.mubr.msk.f32.mxu1 %vm1202_vm0, %v1203_v31 }
  0x71   : > { %969 = vmatmul.mubr.bf16.gmra.mrb[12].mxu0 %v1087_v21 }
  0x72   : > { %972 = vmatprep.mubr.bf16.mxu0 %v1088_v22 }
  0x79   : > { %973 = vmatmul.mubr.bf16.gmra.mrb[16].mxu0 %v1089_v23 }
 0x12c   : > { %v958_v33 = vpop.f32.mrb[0].mxu0  ;;  %v1406_v34 = vpop.f32.mrb[0].mxu1 }
 0x12d   : > { %v477_v35 = vpop.f32.mrb[1].mxu0  ;;  %v1408_v36 = vpop.f32.mrb[1].mxu1  ;;  %v486_v37 = vadd.f32 %v958_v33, %v1404_v32 }
 0x12e   : > { %v478_v38 = vadd.f32 %v1404_v32, %v477_v35  ;;  %v959_v39 = vpop.f32.mrb[2].mxu0  ;;  %v1412_v40 = vpop.f32.mrb[2].mxu1 }
 0x12f   : > { %v480_v41 = vpop.f32.mrb[3].mxu0  ;;  %v1414_v42 = vpop.f32.mrb[3].mxu1  ;;  %v489_v44 = vadd.f32 %v959_v39, %v1404_v32  ;;  %v606_v46 = vmax.f32 %v486_v37, 0.0 }
 0x130   : > { %v604_v43 = vmax.f32 %v478_v38, 0.0  ;;  %v481_v45 = vadd.f32 %v1404_v32, %v480_v41 }
 0x131   : > { %v607_v49 = vmax.f32 %v489_v44, 0.0  ;;  %v640_v56 = vsel %vm636_vm1, %v606_v46, 0.0 }
 0x132   : > { %v605_v47 = vmax.f32 %v481_v45, 0.0  ;;  %v637_v48 = vsel %vm636_vm1, %v604_v43, 0.0 }
 0x133   : > { %v642_v0 = vsel %vm636_vm1, %v607_v49, 0.0 }
 0x134   : > { %v638_v50 = vsel %vm636_vm1, %v605_v47, 0.0  ;;  %v962_v51 = vpop.f32.mrb[4].mxu0  ;;  %v1420_v52 = vpop.f32.mrb[4].mxu1 }
 0x135   : > { %v639_v53 = vadd.f32 %v638_v50, %v637_v48  ;;  %v493_v54 = vpop.f32.mrb[5].mxu0  ;;  %v1422_v55 = vpop.f32.mrb[5].mxu1  ;;  %v502_v57 = vadd.f32 %v962_v51, %v1404_v32 }
 0x136   : > { %v494_v58 = vadd.f32 %v1404_v32, %v493_v54  ;;  %v963_v59 = vpop.f32.mrb[6].mxu0  ;;  %v1427_v60 = vpop.f32.mrb[6].mxu1 }
 0x137   : > { %v641_v61 = vadd.f32 %v640_v56, %v639_v53  ;;  %v496_v62 = vpop.f32.mrb[7].mxu0  ;;  %v1429_v63 = vpop.f32.mrb[7].mxu1  ;;  %v505_v2 = vadd.f32 %v963_v59, %v1404_v32  ;;  %v610_v5 = vmax.f32 %v502_v57, 0.0 }
 0x138   : > { %v608_v1 = vmax.f32 %v494_v58, 0.0  ;;  %v497_v3 = vadd.f32 %v1404_v32, %v496_v62 }
 0x139   : > { %v643_v4 = vadd.f32 %v642_v0, %v641_v61  ;;  %v611_v9 = vmax.f32 %v505_v2, 0.0  ;;  %v648_v16 = vsel %vm636_vm1, %v610_v5, 0.0 }
 0x13a   : > { %v644_v6 = vsel %vm636_vm1, %v608_v1, 0.0  ;;  %v609_v7 = vmax.f32 %v497_v3, 0.0 }
 0x13b   : > { %v645_v8 = vadd.f32 %v644_v6, %v643_v4  ;;  %v650_v24 = vsel %vm636_vm1, %v611_v9, 0.0  ;;  %v558_v9 = vadd.f32 %v1404_v32, %v1408_v36  ;;  %v561_v36 = vadd.f32 %v1404_v32, %v1414_v42 }
 0x13c   : > { %v646_v10 = vsel %vm636_vm1, %v609_v7, 0.0  ;;  %v966_v11 = vpop.f32.mrb[8].mxu0  ;;  %v1436_v12 = vpop.f32.mrb[8].mxu1 }
 0x13d   : > { %v647_v13 = vadd.f32 %v646_v10, %v645_v8  ;;  %v509_v14 = vpop.f32.mrb[9].mxu0  ;;  %v1438_v15 = vpop.f32.mrb[9].mxu1  ;;  %v518_v17 = vadd.f32 %v966_v11, %v1404_v32 }
 0x13e   : > { %v510_v18 = vadd.f32 %v1404_v32, %v509_v14  ;;  %v967_v19 = vpop.f32.mrb[10].mxu0  ;;  %v1443_v20 = vpop.f32.mrb[10].mxu1 }
 0x13f   : > { %v649_v21 = vadd.f32 %v648_v16, %v647_v13  ;;  %v512_v22 = vpop.f32.mrb[11].mxu0  ;;  %v1445_v23 = vpop.f32.mrb[11].mxu1  ;;  %v521_v26 = vadd.f32 %v967_v19, %v1404_v32  ;;  %v614_v29 = vmax.f32 %v518_v17, 0.0 }
 0x140   : > { %v612_v25 = vmax.f32 %v510_v18, 0.0  ;;  %v513_v27 = vadd.f32 %v1404_v32, %v512_v22 }
 0x141   : > { %v651_v28 = vadd.f32 %v650_v24, %v649_v21  ;;  %v615_v35 = vmax.f32 %v521_v26, 0.0  ;;  %v656_v43 = vsel %vm636_vm1, %v614_v29, 0.0 }
 0x142   : > { %v652_v30 = vsel %vm636_vm1, %v612_v25, 0.0  ;;  %v613_v31 = vmax.f32 %v513_v27, 0.0  ;;  %v624_v25 = vmax.f32 %v558_v9, 0.0 }
 0x143   : > { %v653_v33 = vadd.f32 %v652_v30, %v651_v28  ;;  %v658_v49 = vsel %vm636_vm1, %v615_v35, 0.0  ;;  %v566_v28 = vadd.f32 %v1406_v34, %v1404_v32  ;;  %v569_v30 = vadd.f32 %v1412_v40, %v1404_v32 }
 0x144   : > { %v654_v37 = vsel %vm636_vm1, %v613_v31, 0.0  ;;  %v970_v38 = vpop.f32.mrb[12].mxu0  ;;  %v625_v35 = vmax.f32 %v561_v36, 0.0  ;;  %v577_v34 = vadd.f32 %v1404_v32, %v1429_v63 }
 0x145   : > { %v655_v39 = vadd.f32 %v654_v37, %v653_v33  ;;  %v525_v41 = vpop.f32.mrb[13].mxu0  ;;  %v534_v44 = vadd.f32 %v970_v38, %v1404_v32  ;;  %v676_v33 = vsel %vm636_vm1, %v624_v25, 0.0  ;;  %v574_v37 = vadd.f32 %v1404_v32, %v1422_v55 }
 0x146   : > { %v526_v45 = vadd.f32 %v1404_v32, %v525_v41  ;;  %v971_v46 = vpop.f32.mrb[14].mxu0  ;;  %v626_v42 = vmax.f32 %v566_v28, 0.0  ;;  %v627_v41 = vmax.f32 %v569_v30, 0.0 }
 0x147   : > { %v657_v47 = vadd.f32 %v656_v43, %v655_v39  ;;  %v528_v48 = vpop.f32.mrb[15].mxu0  ;;  %v537_v51 = vadd.f32 %v971_v46, %v1404_v32  ;;  %v618_v56 = vmax.f32 %v534_v44, 0.0  ;;  %v678_v43 = vsel %vm636_vm1, %v625_v35, 0.0 }
 0x148   : > { %v616_v50 = vmax.f32 %v526_v45, 0.0  ;;  %v529_v53 = vadd.f32 %v1404_v32, %v528_v48  ;;  %v628_v44 = vmax.f32 %v574_v37, 0.0  ;;  %v680_v40 = vsel %vm636_vm1, %v626_v42, 0.0 }
 0x149   : > { %v659_v54 = vadd.f32 %v658_v49, %v657_v47  ;;  %v619_v61 = vmax.f32 %v537_v51, 0.0  ;;  %v664_v3 = vsel %vm636_vm1, %v618_v56, 0.0  ;;  %v582_v46 = vadd.f32 %v1420_v52, %v1404_v32 }
 0x14a   : > { %v660_v57 = vsel %vm636_vm1, %v616_v50, 0.0  ;;  %v617_v58 = vmax.f32 %v529_v53, 0.0  ;;  %v682_v47 = vsel %vm636_vm1, %v627_v41, 0.0  ;;  %v684_v55 = vsel %vm636_vm1, %v628_v44, 0.0 }
 0x14b   : > { %v661_v59 = vadd.f32 %v660_v57, %v659_v54  ;;  %v666_v10 = vsel %vm636_vm1, %v619_v61, 0.0  ;;  %v585_v49 = vadd.f32 %v1427_v60, %v1404_v32  ;;  %v629_v50 = vmax.f32 %v577_v34, 0.0 }
 0x14c   : > { %v662_v62 = vsel %vm636_vm1, %v617_v58, 0.0  ;;  %v974_v0 = vpop.f32.mrb[16].mxu0  ;;  %v590_v51 = vadd.f32 %v1404_v32, %v1438_v15  ;;  %v630_v63 = vmax.f32 %v582_v46, 0.0  ;;  %v593_v52 = vadd.f32 %v1404_v32, %v1445_v23 }
 0x14d   : > { %v663_v1 = vadd.f32 %v662_v62, %v661_v59  ;;  %v541_v2 = vpop.f32.mrb[17].mxu0  ;;  %v550_v4 = vadd.f32 %v974_v0, %v1404_v32  ;;  %v631_v56 = vmax.f32 %v585_v49, 0.0  ;;  %v686_v57 = vsel %vm636_vm1, %v629_v50, 0.0 }
 0x14e   : > { %v542_v5 = vadd.f32 %v1404_v32, %v541_v2  ;;  %v975_v6 = vpop.f32.mrb[18].mxu0  ;;  %v632_v58 = vmax.f32 %v590_v51, 0.0  ;;  %v688_v61 = vsel %vm636_vm1, %v630_v63, 0.0  ;;  %v598_v60 = vadd.f32 %v1436_v12, %v1404_v32 }
 0x14f   : > { %v665_v7 = vadd.f32 %v664_v3, %v663_v1  ;;  %v544_v8 = vpop.f32.mrb[19].mxu0  ;;  %v553_v13 = vadd.f32 %v975_v6, %v1404_v32  ;;  %v622_v17 = vmax.f32 %v550_v4, 0.0  ;;  %v690_v0 = vsel %vm636_vm1, %v631_v56, 0.0 }
 0x150   : > { %v620_v11 = vmax.f32 %v542_v5, 0.0  ;;  %v545_v14 = vadd.f32 %v1404_v32, %v544_v8  ;;  %v692_v15 = vsel %vm636_vm1, %v632_v58, 0.0  ;;  %v601_v1 = vadd.f32 %v1443_v20, %v1404_v32 }
 0x151   : > { %v667_v16 = vadd.f32 %v666_v10, %v665_v7  ;;  %v623_v22 = vmax.f32 %v553_v13, 0.0  ;;  %v672_v27 = vsel %vm636_vm1, %v622_v17, 0.0  ;;  %v633_v2 = vmax.f32 %v593_v52, 0.0 }
 0x152   : > { %v668_v18 = vsel %vm636_vm1, %v620_v11, 0.0  ;;  %v621_v19 = vmax.f32 %v545_v14, 0.0  ;;  %v634_v4 = vmax.f32 %v598_v60, 0.0  ;;  %v635_v6 = vmax.f32 %v601_v1, 0.0 }
 0x153   : > { %v669_v21 = vadd.f32 %v668_v18, %v667_v16  ;;  %v674_v31 = vsel %vm636_vm1, %v623_v22, 0.0  ;;  %v694_v23 = vsel %vm636_vm1, %v633_v2, 0.0  ;;  %v712_v18 = vld [vmem:[%s1563_s4] sm:$0x1] }
 0x154   : > { %v670_v24 = vsel %vm636_vm1, %v621_v19, 0.0  ;;  %v696_v8 = vsel %vm636_vm1, %v634_v4, 0.0  ;;  %v698_v12 = vsel %vm636_vm1, %v635_v6, 0.0 }
 0x155   : > { %v671_v26 = vadd.f32 %v670_v24, %v669_v21 }
 0x157   : > { %v673_v29 = vadd.f32 %v672_v27, %v671_v26 }
 0x159   : > { %v675_v38 = vadd.f32 %v674_v31, %v673_v29 }
 0x15b   : > { %v677_v39 = vadd.f32 %v676_v33, %v675_v38 }
 0x15d   : > { %v679_v45 = vadd.f32 %v678_v43, %v677_v39 }
 0x15f   : > { %v681_v48 = vadd.f32 %v680_v40, %v679_v45 }
 0x161   : > { %v683_v53 = vadd.f32 %v682_v47, %v681_v48 }
 0x163   : > { %v685_v54 = vadd.f32 %v684_v55, %v683_v53 }
 0x165   : > { %v687_v59 = vadd.f32 %v686_v57, %v685_v54 }
 0x167   : > { %v689_v62 = vadd.f32 %v688_v61, %v687_v59 }
 0x169   : > { %v691_v3 = vadd.f32 %v690_v0, %v689_v62 }
 0x16b   : > { %v693_v5 = vadd.f32 %v692_v15, %v691_v3 }
 0x16d   : > { %v695_v7 = vadd.f32 %v694_v23, %v693_v5 }
 0x16f   : > { %v697_v9 = vadd.f32 %v696_v8, %v695_v7 }
 0x171   : > { %v699_v10 = vadd.f32 %v698_v12, %v697_v9 }
 0x173   : > { %v700_v11 = vrot.slane %v699_v10, 4 }
 0x175   : > { %v701_v13 = vadd.f32 %v700_v11, %v699_v10 }
 0x177   : > { %v702_v14 = vrot.slane %v701_v13, 2 }
 0x179   : > { %v703_v32 = vadd.f32 %v702_v14, %v701_v13 }
 0x17b   : > { %v704_v20 = vrot.slane %v703_v32, 1 }
 0x17d   : > { %v705_v16 = vadd.f32 %v704_v20, %v703_v32 }
 0x17f   : > { %v707_v17 = vmul.f32 0.00390625, %v705_v16 }
 0x181   : > { %997 = vmatmul.mubr.msk.f32.vlgmr.msra.gmra.mrb[12].mxu1 %vm636_vm1, %v707_v17 }
 0x254   : > { %v782_v19 = vpop.f32.mrb[12].mxu1 }
 0x255   : > { %v783_v21 = vadd.f32 %v782_v19, %v712_v18  ;;  %v998_v22 = vpop.f32.mrb[13].mxu1 }
 0x257   : > { %v906_v24 = vmul.f32 -1.442695, %v783_v21 }
 0x259   : > { %1096 = vpow2.f32 %v906_v24 }
 0x263   : > { %v1097_v25 = vpop.eup %1096 }
 0x264   : > { %v789_v36 = vadd.f32 1.0, %v1097_v25 }
 0x266   : > { %1098 = vrcp.f32 %v789_v36 }
 0x270   : > { %v1099_v26 = vpop.eup %1098 }
 0x271   : > { %792 = vst [vmem:[%s241_s12] sm:$0x1] %v1099_v26 }
 0x272   : > { %1143 = shalt.err (!%p1140_p2)
}
 0x273   : > { %s1144_s23 = scalar_lea.hbm %s1515_s8, 16  ;;  %s1148_s13 = scalar_lea.hbm %s1564_s5, 32 }
 0x274   : > { %p1145_p4 = scmp.ne.s32.totalorder %s1515_s8, %s1144_s23  ;;  %p1149_p9 = scmp.lt.u32.totalorder %s1515_s8, %s1564_s5 }
 0x275   : > { %p1150_p1 = scmp.lt.u32.totalorder %s1148_s13, %s1144_s23  ;;  %p1152_p6 = scmp.lt.u32.totalorder %s1144_s23, %s1515_s8 }
 0x276   : > { %p1146_p5 = pnand %p1145_p4, %p1571_p11 }
 0x277   : > { %p1151_p3 = por %p1150_p1, %p1149_p9 }
 0x278   : > { %p1147_p7 = pneg %p1146_p5 }
 0x279   : > { %p1153_p12 = por %p1152_p6, %p1151_p3 }
 0x27b   : > { %p1154_p13 = pnand %p1153_p12, %p1147_p7 }
 0x27d   : > { %1157 = shalt.err (!%p1154_p13)
}
 0x27e   : > { %1023 = dma.vmem_to_hbm [thread:$0]  (%p1571_p11), %s1517_s14, 16, %s1515_s8, %s794_s7  }
 0x27f PF: > { %s818_s26 = sand.u32 1, %s1184_s18   ;;  %p1572_p8 = scmp.ne.s32.totalorder %s1569_s6, 0 }
 0x280   : > { %p1573_p10 = scmp.ge.s32.totalorder %s1196_s21, 2  ;;  %s819_s12 = scalar_lea.sflag [#allocation4], %s818_s26 }
 0x282   : > { %p1030_p0 = pnand %p1573_p10, %p1572_p8 }
 0x284   : > { %1179 = dma.done.wait (!%p1030_p0), %s819_s12, 16  }
 0x285   : > { %1181 = vsyncadd (!%p1030_p0), %s819_s12, 4294967280  ;;  %p18_p2 = scmp.ge.s32.totalorder %s1260_s24, 4   ;;  %s1574_s18 = smov %s1188_s19 }
 0x286   : > { %s1575_s19 = smov %s1192_s20  ;;  %s1576_s20 = smov %s1272_s27 }
 0x287   : > { %s1577_s21 = smov %s1260_s24  ;;  %20 = sbr.rel (!%p18_p2) target bundleno = 5 (0x5), region = 85 }
 0x28e   :  { %823 = vsyncpa [#allocation3], 1 }
 0x28f   :  { %825 = vsyncpa [#allocation3 + $0x1], 1 }
 0x290   :  { %826 = vsyncpa [#allocation4], 1 }
 0x291   :  { %828 = vsyncpa [#allocation4 + $0x1], 1 }

</bundles_post_ra>
